<compile_context>
chip_gen: v5e
topology: v5e:2x2
jax: 0.10.0
libtpu: 0.0.40
codegen_flags: <defaults>
</compile_context>

<pallas_src>
import jax
import jax.numpy as jnp
import numpy as np
from jax import lax
from jax.experimental import pallas as pl
from jax.experimental.pallas import tpu as pltpu


# ---------------------------------------------------------------------------
# Kernel: one grid step = a (M, L) slab of B_TILE * P images.
# ---------------------------------------------------------------------------
def _resnet_sn_block_kernel(x_ref, mask_ref, a1_ref, a2_ref, b_ref, out_ref):
    """x_ref    : (M, L_in)           M = B_TILE*H sublanes, L_in = P*W*Cin lanes (f32)
       mask_ref : (ks, M, 1)          0/1 row-validity masks per ky tap (f32)
       a1_ref   : (ks, L_in,  L_out)  banded conv1 operators, block-diag over P
       a2_ref   : (ks, L_out, L_out)  banded conv2 operators
       b_ref    : (2, L_out)          [bias1 ; bias2], tiled over (P, W) (f32)
       out_ref  : (M, L_out)
    """
    M = x_ref.shape[0]
    ks = a1_ref.shape[0]
    pad = ks // 2

    x = x_ref[...]                                         # (M, L_in) f32

    def conv(v, a_ref, bias_row):
        # ky == pad tap: identity row shift; initializes the accumulator
        # (no zeros-fill; bias added once at the end).
        acc = jnp.dot(v.astype(a_ref.dtype), a_ref[pad],
                      preferred_element_type=jnp.float32)
        for ky in range(ks):                               # static unroll (ks=3)
            if ky == pad:
                continue
            d = ky - pad                                   # source row offset
            # Sublane rotate on the XLU + VPU mask instead of an (H,H) MXU
            # shift matmul: rolled[r] = v[(r + d) % M]; the mask zeroes rows
            # whose source crossed an image / zero-padding boundary.
            rolled = pltpu.roll(v, shift=(-d) % M, axis=0)
            sv = (rolled * mask_ref[ky]).astype(a_ref.dtype)
            acc = acc + jnp.dot(sv, a_ref[ky],
                                preferred_element_type=jnp.float32)
        return acc + bias_row

    h = conv(x, a1_ref, b_ref[0:1, :])
    h = jnp.where(h > 0, h, 0.2 * h)                       # LeakyReLU(0.2), f32
    y = conv(h, a2_ref, b_ref[1:2, :])
    out_ref[...] = (y + x).astype(out_ref.dtype)           # residual add (f32)


# ---------------------------------------------------------------------------
# Weight-only preprocessing (plain JAX / numpy glue).
# ---------------------------------------------------------------------------
def _lane_conv_matrices(w_oihw, W):
    """OIHW conv weight -> (ks, W*Cin, W*Cout) banded lane-space operators.

    With images flattened to rows of length W*Cin (channels fastest),
        conv_out_rows = sum_ky RowShift[ky](in_rows) @ Band[ky]
    reproduces Conv2d(stride=1, padding=ks//2) with zero padding along W."""
    Cout, Cin, ks, _ = w_oihw.shape
    p = ks // 2
    w_hwio = jnp.transpose(w_oihw, (2, 3, 1, 0))          # (ky, kx, Cin, Cout)
    kx = np.arange(ks)[:, None, None]
    src = np.arange(W)[None, :, None]
    dst = np.arange(W)[None, None, :]
    sel = jnp.asarray((src == dst + kx - p).astype(np.float32))   # (ks, W, W)
    band = jnp.einsum('kst,ykio->ysito', sel, w_hwio)     # (ky, Wsrc, Cin, Wdst, Cout)
    return band.reshape(ks, W * Cin, W * Cout)


def _pack_lanes(band, P):
    """Block-diagonal lane packing: kron(I_P, Band[ky]) for P images per row."""
    if P == 1:
        return band
    ks, K, Nn = band.shape
    eye = jnp.eye(P, dtype=band.dtype)
    return jnp.einsum('pq,kio->kpiqo', eye, band).reshape(ks, P * K, P * Nn)


def _row_masks(ks, H, M):
    """(ks, M, 1) 0/1 masks: 1 where row y + (ky - ks//2) stays inside [0, H)."""
    p = ks // 2
    y = np.arange(M) % H
    masks = []
    for ky in range(ks):
        d = ky - p
        masks.append(((y + d >= 0) & (y + d < H)).astype(np.float32))
    return jnp.asarray(np.stack(masks))[:, :, None]


def resnet_sn_block(x_nchw, w1_oihw, b1, w2_oihw, b2, ks,
                    matmul_dtype=jnp.bfloat16):
    """Forward pass of ResnetSNBlock. Weights must already be spectrally normalized."""
    N, C, H, W = x_nchw.shape
    Cout = w1_oihw.shape[0]
    assert Cout == C, "residual add requires in_dim == out_dim"
    WC = W * C

    # ---- tiling heuristics ------------------------------------------------
    # Lane packing: P images side-by-side so rows are >= 128 lanes wide.
    P = max(1, 128 // WC)
    n_groups = -(-N // P)                       # lane-packed image groups
    # Sublane batching: stack B_TILE groups so M = B_TILE*H ~ 128 sublanes,
    # but keep >= 2 grid steps when possible so both v7x TensorCores get work.
    b_pref = max(1, 128 // H)
    steps = -(-n_groups // b_pref)
    if steps < 2 and b_pref > 1 and n_groups > 1:
        steps = 2
    B_TILE = -(-n_groups // steps)
    steps = -(-n_groups // B_TILE)
    G = P * B_TILE                              # images per grid step
    N_pad = steps * G
    M = B_TILE * H
    L_in = P * W * C
    L_out = P * W * Cout

    # NCHW -> lane-dense slabs (steps, B_TILE*H, P*W*C).
    # TODO(synk): when chaining blocks, hoist this layout conversion to the
    # model entry/exit so the transposes are not paid per block.
    x_rows = jnp.transpose(x_nchw, (0, 2, 3, 1)).reshape(N, H, WC)
    if N_pad != N:
        x_rows = jnp.pad(x_rows, ((0, N_pad - N), (0, 0), (0, 0)))
    x_slab = (x_rows.reshape(steps, B_TILE, P, H, WC)
                    .transpose(0, 1, 3, 2, 4)
                    .reshape(steps, M, L_in))

    # TODO(synk): for channel counts >> 16 the banded operator wastes MXU work
    # on structural zeros; switch to an im2col dense-K formulation there.
    band1 = _pack_lanes(_lane_conv_matrices(w1_oihw, W), P).astype(matmul_dtype)
    band2 = _pack_lanes(_lane_conv_matrices(w2_oihw, W), P).astype(matmul_dtype)
    masks = _row_masks(ks, H, M)                                 # (ks, M, 1)
    bias = jnp.stack([jnp.tile(b1, P * W),
                      jnp.tile(b2, P * W)]).astype(jnp.float32)  # (2, L_out)

    out_slab = pl.pallas_call(
        _resnet_sn_block_kernel,
        out_shape=jax.ShapeDtypeStruct((steps, M, L_out), jnp.float32),
        grid=(steps,),
        in_specs=[
            pl.BlockSpec((None, M, L_in), lambda g: (g, 0, 0)),      # x slab
            pl.BlockSpec((ks, M, 1), lambda g: (0, 0, 0)),           # row masks
            pl.BlockSpec((ks, L_in, L_out), lambda g: (0, 0, 0)),    # conv1 band
            pl.BlockSpec((ks, L_out, L_out), lambda g: (0, 0, 0)),   # conv2 band
            pl.BlockSpec((2, L_out), lambda g: (0, 0)),              # biases
        ],
        out_specs=pl.BlockSpec((None, M, L_out), lambda g: (g, 0, 0)),
        compiler_params=pltpu.CompilerParams(
            dimension_semantics=("parallel",),      # megacore / v7x 2-TC sharding
            vmem_limit_bytes=32 * 1024 * 1024,      # explicit; fits all gens
        ),
    )(x_slab, masks, band1, band2, bias)

    out = (out_slab.reshape(steps, B_TILE, H, P, W, Cout)
                   .transpose(0, 1, 3, 2, 4, 5)
                   .reshape(N_pad, H, W, Cout)[:N])
    return jnp.transpose(out, (0, 3, 1, 2))               # back to NCHW


def spectral_normalize(w_oihw, u, power_iterations=1, eps=1e-12):
    """SAGAN-style SpectralNorm: power iteration on w.view(out_dim, -1),
    sigma = u^T W v, weight <- weight / sigma.  Returns (w_normalized, u_new);
    the caller must persist u across forwards (as PyTorch's SpectralNorm does)."""
    assert power_iterations >= 1
    cout = w_oihw.shape[0]
    w_mat = w_oihw.reshape(cout, -1)

    def l2n(v):
        return v / (jnp.linalg.norm(v) + eps)

    v = None
    for _ in range(power_iterations):
        v = l2n(w_mat.T @ u)
        u = l2n(w_mat @ v)
    sigma = u @ (w_mat @ v)
    return w_oihw / sigma, u


if __name__ == "__main__":
    N, C, H, W, ks = 2, 4, 16, 16, 3   # in_dim == out_dim == 4

    key = jax.random.PRNGKey(0)
    k_x, k_w1, k_b1, k_w2, k_b2, k_u1, k_u2, k_x2 = jax.random.split(key, 8)

    x = jax.random.normal(k_x, (N, C, H, W), jnp.float32)

    # Deterministic Conv2d-style init (uniform in +/- 1/sqrt(fan_in)).
    fan_in = C * ks * ks
    bound = 1.0 / (fan_in ** 0.5)
    w1 = jax.random.uniform(k_w1, (C, C, ks, ks), jnp.float32, -bound, bound)
    b1 = jax.random.uniform(k_b1, (C,), jnp.float32, -bound, bound)
    w2 = jax.random.uniform(k_w2, (C, C, ks, ks), jnp.float32, -bound, bound)
    b2 = jax.random.uniform(k_b2, (C,), jnp.float32, -bound, bound)

    # Spectral-norm "u" vectors (the module's persistent buffers).
    u1 = jax.random.normal(k_u1, (C,), jnp.float32)
    u2 = jax.random.normal(k_u2, (C,), jnp.float32)
    w1n, u1 = spectral_normalize(w1, u1)
    w2n, u2 = spectral_normalize(w2, u2)

    # Pure-JAX reference for correctness.
    def reference(xi):
        y = lax.conv_general_dilated(
            xi, w1n, (1, 1), [(ks // 2, ks // 2)] * 2,
            dimension_numbers=("NCHW", "OIHW", "NCHW"))
        y = y + b1[None, :, None, None]
        y = jnp.where(y > 0, y, 0.2 * y)
        y = lax.conv_general_dilated(
            y, w2n, (1, 1), [(ks // 2, ks // 2)] * 2,
            dimension_numbers=("NCHW", "OIHW", "NCHW"))
        y = y + b2[None, :, None, None]
        return y + xi

    ref_out = reference(x)

    # 1) f32 matmul operands: the roll/mask/band reformulation is exact.
    out_f32 = jax.block_until_ready(
        resnet_sn_block(x, w1n, b1, w2n, b2, ks, matmul_dtype=jnp.float32))
    assert out_f32.shape == (N, C, H, W)
    assert jnp.allclose(out_f32, ref_out, atol=1e-4, rtol=1e-4), (
        float(jnp.max(jnp.abs(out_f32 - ref_out))))

    # 2) bf16 MXU operands (the performance default): tolerance relaxed for
    #    bf16 input rounding; accumulation / bias / residual remain f32.
    out_bf16 = jax.block_until_ready(
        resnet_sn_block(x, w1n, b1, w2n, b2, ks))
    assert jnp.allclose(out_bf16, ref_out, atol=5e-2, rtol=5e-2), (
        float(jnp.max(jnp.abs(out_bf16 - ref_out))))

    # 3) Larger batch: exercises the batch-tiled, padded, multi-grid-step path.
    N2 = 20
    x2 = jax.random.normal(k_x2, (N2, C, H, W), jnp.float32)
    out2 = jax.block_until_ready(resnet_sn_block(x2, w1n, b1, w2n, b2, ks))
    ref2 = reference(x2)
    assert out2.shape == (N2, C, H, W)
    assert jnp.allclose(out2, ref2, atol=5e-2, rtol=5e-2), (
        float(jnp.max(jnp.abs(out2 - ref2))))

    print("KERNEL_OK")
</pallas_src>

<mosaic_0001>
module attributes {stable_mosaic.version = 11 : i64} {
  func.func @_resnet_sn_block_kernel(%arg0: i32, %arg1: memref<1x16x128xf32, #tpu.memory_space<vmem>>, %arg2: memref<3x16x1xf32, #tpu.memory_space<vmem>>, %arg3: memref<3x128x128xf32, #tpu.memory_space<vmem>>, %arg4: memref<3x128x128xf32, #tpu.memory_space<vmem>>, %arg5: memref<2x128xf32, #tpu.memory_space<vmem>>, %arg6: memref<1x16x128xf32, #tpu.memory_space<vmem>>) attributes {dimension_semantics = [#tpu.dimension_semantics<parallel>], iteration_bounds = array<i64: 1>, scalar_prefetch = 0 : i64, scratch_operands = 0 : i64, tpu.core_type = #tpu.core_type<tc>, window_params = [{transform_indices = @transform_0, window_bounds = array<i64: 1, 16, 128>}, {pipeline_mode = #tpu.pipeline_mode<synchronous>, transform_indices = @transform_1, window_bounds = array<i64: 3, 16, 1>}, {pipeline_mode = #tpu.pipeline_mode<synchronous>, transform_indices = @transform_2, window_bounds = array<i64: 3, 128, 128>}, {pipeline_mode = #tpu.pipeline_mode<synchronous>, transform_indices = @transform_3, window_bounds = array<i64: 3, 128, 128>}, {pipeline_mode = #tpu.pipeline_mode<synchronous>, transform_indices = @transform_4, window_bounds = array<i64: 2, 128>}, {transform_indices = @transform_5, window_bounds = array<i64: 1, 16, 128>}]} {
    %c0 = arith.constant 0 : index
    %c0_0 = arith.constant 0 : index
    %c0_1 = arith.constant 0 : index
    %0 = vector.load %arg1[%c0, %c0_0, %c0_1] : memref<1x16x128xf32, #tpu.memory_space<vmem>>, vector<1x16x128xf32>
    %1 = vector.shape_cast %0 : vector<1x16x128xf32> to vector<16x128xf32>
    %c0_2 = arith.constant 0 : index
    %c0_3 = arith.constant 0 : index
    %2 = vector.load %arg5[%c0_2, %c0_3] : memref<2x128xf32, #tpu.memory_space<vmem>>, vector<1x128xf32>
    %c1 = arith.constant 1 : index
    %c0_4 = arith.constant 0 : index
    %c0_5 = arith.constant 0 : index
    %3 = vector.load %arg3[%c1, %c0_4, %c0_5] : memref<3x128x128xf32, #tpu.memory_space<vmem>>, vector<1x128x128xf32>
    %4 = vector.shape_cast %3 : vector<1x128x128xf32> to vector<128x128xf32>
    %cst = arith.constant dense<0.000000e+00> : vector<16x128xf32>
    %5 = tpu.matmul %1, %4, %cst {dimension_numbers = #tpu.dot_dimension_numbers<[1], [0], [0], [1], [0, 0, 1, 1], [], []>} : vector<16x128xf32>, vector<128x128xf32>, vector<16x128xf32> -> vector<16x128xf32>
    %c1_i32 = arith.constant 1 : i32
    %6 = tpu.dynamic_rotate %1 by %c1_i32 dim 0 : vector<16x128xf32>, i32 -> vector<16x128xf32>
    %c0_6 = arith.constant 0 : index
    %c0_7 = arith.constant 0 : index
    %c0_8 = arith.constant 0 : index
    %7 = vector.load %arg2[%c0_6, %c0_7, %c0_8] : memref<3x16x1xf32, #tpu.memory_space<vmem>>, vector<1x16x1xf32>
    %8 = vector.shape_cast %7 : vector<1x16x1xf32> to vector<16x1xf32>
    %9 = vector.broadcast %8 : vector<16x1xf32> to vector<16x128xf32>
    %10 = arith.mulf %6, %9 : vector<16x128xf32>
    %c0_9 = arith.constant 0 : index
    %c0_10 = arith.constant 0 : index
    %c0_11 = arith.constant 0 : index
    %11 = vector.load %arg3[%c0_9, %c0_10, %c0_11] : memref<3x128x128xf32, #tpu.memory_space<vmem>>, vector<1x128x128xf32>
    %12 = vector.shape_cast %11 : vector<1x128x128xf32> to vector<128x128xf32>
    %cst_12 = arith.constant dense<0.000000e+00> : vector<16x128xf32>
    %13 = tpu.matmul %10, %12, %cst_12 {dimension_numbers = #tpu.dot_dimension_numbers<[1], [0], [0], [1], [0, 0, 1, 1], [], []>} : vector<16x128xf32>, vector<128x128xf32>, vector<16x128xf32> -> vector<16x128xf32>
    %14 = arith.addf %5, %13 : vector<16x128xf32>
    %c15_i32 = arith.constant 15 : i32
    %15 = tpu.dynamic_rotate %1 by %c15_i32 dim 0 : vector<16x128xf32>, i32 -> vector<16x128xf32>
    %c2 = arith.constant 2 : index
    %c0_13 = arith.constant 0 : index
    %c0_14 = arith.constant 0 : index
    %16 = vector.load %arg2[%c2, %c0_13, %c0_14] : memref<3x16x1xf32, #tpu.memory_space<vmem>>, vector<1x16x1xf32>
    %17 = vector.shape_cast %16 : vector<1x16x1xf32> to vector<16x1xf32>
    %18 = vector.broadcast %17 : vector<16x1xf32> to vector<16x128xf32>
    %19 = arith.mulf %15, %18 : vector<16x128xf32>
    %c2_15 = arith.constant 2 : index
    %c0_16 = arith.constant 0 : index
    %c0_17 = arith.constant 0 : index
    %20 = vector.load %arg3[%c2_15, %c0_16, %c0_17] : memref<3x128x128xf32, #tpu.memory_space<vmem>>, vector<1x128x128xf32>
    %21 = vector.shape_cast %20 : vector<1x128x128xf32> to vector<128x128xf32>
    %cst_18 = arith.constant dense<0.000000e+00> : vector<16x128xf32>
    %22 = tpu.matmul %19, %21, %cst_18 {dimension_numbers = #tpu.dot_dimension_numbers<[1], [0], [0], [1], [0, 0, 1, 1], [], []>} : vector<16x128xf32>, vector<128x128xf32>, vector<16x128xf32> -> vector<16x128xf32>
    %23 = arith.addf %14, %22 : vector<16x128xf32>
    %24 = vector.broadcast %2 : vector<1x128xf32> to vector<16x128xf32>
    %25 = arith.addf %23, %24 : vector<16x128xf32>
    %cst_19 = arith.constant 0.000000e+00 : f32
    %26 = vector.broadcast %cst_19 : f32 to vector<16x128xf32>
    %27 = arith.cmpf ogt, %25, %26 : vector<16x128xf32>
    %cst_20 = arith.constant 2.000000e-01 : f32
    %28 = vector.broadcast %cst_20 : f32 to vector<16x128xf32>
    %29 = arith.mulf %28, %25 : vector<16x128xf32>
    %30 = arith.select %27, %25, %29 : vector<16x128xi1>, vector<16x128xf32>
    %c1_21 = arith.constant 1 : index
    %c0_22 = arith.constant 0 : index
    %31 = vector.load %arg5[%c1_21, %c0_22] : memref<2x128xf32, #tpu.memory_space<vmem>>, vector<1x128xf32>
    %c1_23 = arith.constant 1 : index
    %c0_24 = arith.constant 0 : index
    %c0_25 = arith.constant 0 : index
    %32 = vector.load %arg4[%c1_23, %c0_24, %c0_25] : memref<3x128x128xf32, #tpu.memory_space<vmem>>, vector<1x128x128xf32>
    %33 = vector.shape_cast %32 : vector<1x128x128xf32> to vector<128x128xf32>
    %cst_26 = arith.constant dense<0.000000e+00> : vector<16x128xf32>
    %34 = tpu.matmul %30, %33, %cst_26 {dimension_numbers = #tpu.dot_dimension_numbers<[1], [0], [0], [1], [0, 0, 1, 1], [], []>} : vector<16x128xf32>, vector<128x128xf32>, vector<16x128xf32> -> vector<16x128xf32>
    %c1_i32_27 = arith.constant 1 : i32
    %35 = tpu.dynamic_rotate %30 by %c1_i32_27 dim 0 : vector<16x128xf32>, i32 -> vector<16x128xf32>
    %c0_28 = arith.constant 0 : index
    %c0_29 = arith.constant 0 : index
    %c0_30 = arith.constant 0 : index
    %36 = vector.load %arg2[%c0_28, %c0_29, %c0_30] : memref<3x16x1xf32, #tpu.memory_space<vmem>>, vector<1x16x1xf32>
    %37 = vector.shape_cast %36 : vector<1x16x1xf32> to vector<16x1xf32>
    %38 = vector.broadcast %37 : vector<16x1xf32> to vector<16x128xf32>
    %39 = arith.mulf %35, %38 : vector<16x128xf32>
    %c0_31 = arith.constant 0 : index
    %c0_32 = arith.constant 0 : index
    %c0_33 = arith.constant 0 : index
    %40 = vector.load %arg4[%c0_31, %c0_32, %c0_33] : memref<3x128x128xf32, #tpu.memory_space<vmem>>, vector<1x128x128xf32>
    %41 = vector.shape_cast %40 : vector<1x128x128xf32> to vector<128x128xf32>
    %cst_34 = arith.constant dense<0.000000e+00> : vector<16x128xf32>
    %42 = tpu.matmul %39, %41, %cst_34 {dimension_numbers = #tpu.dot_dimension_numbers<[1], [0], [0], [1], [0, 0, 1, 1], [], []>} : vector<16x128xf32>, vector<128x128xf32>, vector<16x128xf32> -> vector<16x128xf32>
    %43 = arith.addf %34, %42 : vector<16x128xf32>
    %c15_i32_35 = arith.constant 15 : i32
    %44 = tpu.dynamic_rotate %30 by %c15_i32_35 dim 0 : vector<16x128xf32>, i32 -> vector<16x128xf32>
    %c2_36 = arith.constant 2 : index
    %c0_37 = arith.constant 0 : index
    %c0_38 = arith.constant 0 : index
    %45 = vector.load %arg2[%c2_36, %c0_37, %c0_38] : memref<3x16x1xf32, #tpu.memory_space<vmem>>, vector<1x16x1xf32>
    %46 = vector.shape_cast %45 : vector<1x16x1xf32> to vector<16x1xf32>
    %47 = vector.broadcast %46 : vector<16x1xf32> to vector<16x128xf32>
    %48 = arith.mulf %44, %47 : vector<16x128xf32>
    %c2_39 = arith.constant 2 : index
    %c0_40 = arith.constant 0 : index
    %c0_41 = arith.constant 0 : index
    %49 = vector.load %arg4[%c2_39, %c0_40, %c0_41] : memref<3x128x128xf32, #tpu.memory_space<vmem>>, vector<1x128x128xf32>
    %50 = vector.shape_cast %49 : vector<1x128x128xf32> to vector<128x128xf32>
    %cst_42 = arith.constant dense<0.000000e+00> : vector<16x128xf32>
    %51 = tpu.matmul %48, %50, %cst_42 {dimension_numbers = #tpu.dot_dimension_numbers<[1], [0], [0], [1], [0, 0, 1, 1], [], []>} : vector<16x128xf32>, vector<128x128xf32>, vector<16x128xf32> -> vector<16x128xf32>
    %52 = arith.addf %43, %51 : vector<16x128xf32>
    %53 = vector.broadcast %31 : vector<1x128xf32> to vector<16x128xf32>
    %54 = arith.addf %52, %53 : vector<16x128xf32>
    %55 = arith.addf %54, %1 : vector<16x128xf32>
    %c0_43 = arith.constant 0 : index
    %c0_44 = arith.constant 0 : index
    %c0_45 = arith.constant 0 : index
    %56 = vector.load %arg6[%c0_43, %c0_44, %c0_45] : memref<1x16x128xf32, #tpu.memory_space<vmem>>, vector<1x16x128xf32>
    %57 = vector.shape_cast %56 : vector<1x16x128xf32> to vector<16x128xf32>
    %58 = vector.shape_cast %55 : vector<16x128xf32> to vector<1x16x128xf32>
    tpu.vector_store %arg6[%c0_43, %c0_44, %c0_45], %58 {strides = array<i32>} : memref<1x16x128xf32, #tpu.memory_space<vmem>>, vector<1x16x128xf32>,
    return
  }
  func.func @transform_0(%arg0: i32) -> (i32, i32, i32) {
    %c0_i32 = arith.constant 0 : i32
    %c0_i32_0 = arith.constant 0 : i32
    %c0_i32_1 = arith.constant 0 : i32
    return %arg0, %c0_i32, %c0_i32_0 : i32, i32, i32
  }
  func.func @transform_1(%arg0: i32) -> (i32, i32, i32) {
    %c0_i32 = arith.constant 0 : i32
    %c0_i32_0 = arith.constant 0 : i32
    %c0_i32_1 = arith.constant 0 : i32
    %c0_i32_2 = arith.constant 0 : i32
    return %c0_i32, %c0_i32_0, %c0_i32_1 : i32, i32, i32
  }
  func.func @transform_2(%arg0: i32) -> (i32, i32, i32) {
    %c0_i32 = arith.constant 0 : i32
    %c0_i32_0 = arith.constant 0 : i32
    %c0_i32_1 = arith.constant 0 : i32
    %c0_i32_2 = arith.constant 0 : i32
    return %c0_i32, %c0_i32_0, %c0_i32_1 : i32, i32, i32
  }
  func.func @transform_3(%arg0: i32) -> (i32, i32, i32) {
    %c0_i32 = arith.constant 0 : i32
    %c0_i32_0 = arith.constant 0 : i32
    %c0_i32_1 = arith.constant 0 : i32
    %c0_i32_2 = arith.constant 0 : i32
    return %c0_i32, %c0_i32_0, %c0_i32_1 : i32, i32, i32
  }
  func.func @transform_4(%arg0: i32) -> (i32, i32) {
    %c0_i32 = arith.constant 0 : i32
    %c0_i32_0 = arith.constant 0 : i32
    %c0_i32_1 = arith.constant 0 : i32
    return %c0_i32, %c0_i32_0 : i32, i32
  }
  func.func @transform_5(%arg0: i32) -> (i32, i32, i32) {
    %c0_i32 = arith.constant 0 : i32
    %c0_i32_0 = arith.constant 0 : i32
    %c0_i32_1 = arith.constant 0 : i32
    return %arg0, %c0_i32, %c0_i32_0 : i32, i32, i32
  }
}

</mosaic_0001>

<bundles_post_ra>
// kernel: tpu_custom_call.1
= control target key start
LH: loop header
LB: loop body
LE: loop exit
PB: predicated region body
PF: predicated region fallthrough
CT: control target
= control target key end

     0   :  { %10 = vsyncpa [#allocation3], 0  ;;  %s648_s0 = inlined_call_operand.vmem [shape: f32[1,16,128], index: 0, kind: input, shape index: {}]   ;;  %s649_s1 = inlined_call_operand.vmem [shape: f32[3,16,1], index: 1, kind: input, shape index: {}]   ;;  %s650_s2 = inlined_call_operand.hbm [shape: f32[3,128,128], index: 2, kind: input, shape index: {}]   ;;  %s651_s3 = inlined_call_operand.hbm [shape: f32[3,128,128], index: 3, kind: input, shape index: {}]   ;;  %s652_s4 = inlined_call_operand.vmem [shape: f32[2,128], index: 4, kind: input, shape index: {}]   ;;  %s653_s5 = inlined_call_operand.hbm [shape: f32[1,16,128], index: 5, kind: output, shape index: {}]  }
   0x1   :  { %11 = vsyncpa [#allocation6], 0 }
   0x2   :  { %12 = vsyncpa [#allocation4], 0  ;;  %s21_s20 = sshll.u32 %s650_s2, 4  ;;  %s510_s21 = smov [#allocation2]   ;;  %s22_s20 = int_to_ptr.hbm [resolvable:$true] %s21_s20 }
   0x3   :  { %s23_s22 = sshll.u32 %s510_s21, 4  ;;  %s34_s25 = sshll.u32 %s651_s3, 4  ;;  %s24_s22 = int_to_ptr.vmem [resolvable:$true] %s23_s22  ;;  %s35_s25 = int_to_ptr.hbm [resolvable:$true] %s34_s25 }
   0x4   :  { %s511_s26 = smov 128   ;;  %s512_s27 = smov 8  }
   0x5   :  { %29 = dma.hbm_to_vmem [thread:$0]  %s22_s20, 6144, %s24_s22, [#allocation3], %s511_s26, %s511_s26, %s512_s27  }
   0x6   :  { %s513_s28 = smov [#allocation5]  }
   0x7   :  { %s36_s29 = sshll.u32 %s513_s28, 4  ;;  %s37_s29 = int_to_ptr.vmem [resolvable:$true] %s36_s29 }
   0x8   :  { %42 = dma.hbm_to_vmem [thread:$0]  %s35_s25, 6144, %s37_s29, [#allocation6], %s511_s26, %s511_s26, %s512_s27  }
   0x9   :  { %504 = dma.done.wait [#allocation3], 6144  }
   0xa   :  { %505 = vsyncadd [#allocation3], 4294961152 }
   0xb   :  { %506 = dma.done.wait [#allocation6], 6144  }
   0xc   :  { %507 = vsyncadd [#allocation6], 4294961152  ;;  %v514_v0 = vmov 0   ;;  %v389_v1 = vld [vmem:[%s649_s1 + $0x28] sm:$0xff]  ;;  %v388_v2 = vld [vmem:[%s649_s1 + $0x20] sm:$0xff]  ;;  %v75_v55 = vlaneseq  ;;  %s515_s17 = smov [#allocation7]  }
   0xd   :  { %429 = vset.pattern.permute.xlu1 %v514_v0  ;;  %428 = vset.pattern.permute.xlu0 %v514_v0  ;;  %v192_v3 = vld [vmem:[#allocation2 + $0x178] sm:$0xff]  ;;  %v191_v4 = vld [vmem:[#allocation2 + $0x170] sm:$0xff]  ;;  %v190_v6 = vld [vmem:[#allocation2 + $0x168] sm:$0xff]  ;;  %s372_s18 = sshll.u32 %s515_s17, 4  ;;  %s374_s21 = sshll.u32 %s653_s5, 4  ;;  %s373_s18 = int_to_ptr.vmem [resolvable:$true] %s372_s18  ;;  %s375_s21 = int_to_ptr.hbm [resolvable:$true] %s374_s21 }
   0xe   :  { %171 = vperm.xlu1 %429, %v389_v1   ;;  %166 = vperm.xlu0 %428, %v388_v2   ;;  %v109_v5 = vld [vmem:[#allocation2 + $0x78] sm:$0xff]  ;;  %v108_v8 = vld [vmem:[#allocation2 + $0x70] sm:$0xff]  ;;  %v107_v10 = vld [vmem:[#allocation2 + $0x68] sm:$0xff]  ;;  %v582_v62 = vshrl.u32 %v75_v55, 7 }
   0xf   :  { %193 = vmatpush.msra.mxu2 %v192_v3  ;;  %110 = vmatpush.msra.mxu0 %v109_v5  ;;  %v72_v7 = vld [vmem:[#allocation2 + $0xf8] sm:$0xff]  ;;  %v71_v9 = vld [vmem:[#allocation2 + $0xf0] sm:$0xff]  ;;  %v189_v11 = vld [vmem:[#allocation2 + $0x160] sm:$0xff] }
  0x10   :  { %133 = vmatpush.msra.mxu1 %v72_v7  ;;  %v70_v12 = vld [vmem:[#allocation2 + $0xe8] sm:$0xff]  ;;  %v80_v14 = vld [vmem:[%s649_s1] sm:$0xff]  ;;  %v188_v15 = vld [vmem:[#allocation2 + $0x158] sm:$0xff]  ;;  %vm158_vm0 = vcmp.lt.s32.totalorder %v582_v62, 7  ;;  %vm77_vm1 = vcmp.lt.s32.totalorder %v582_v62, 1 }
  0x11   :  { %194 = vmatpush.msra.mxu2 %v191_v4  ;;  %111 = vmatpush.msra.mxu0 %v108_v8  ;;  %v81_v13 = vld [vmem:[%s649_s1 + $0x8] sm:$0xff]  ;;  %v106_v16 = vld [vmem:[#allocation2 + $0x60] sm:$0xff]  ;;  %v187_v18 = vld [vmem:[#allocation2 + $0x150] sm:$0xff] }
  0x12   :  { %134 = vmatpush.msra.mxu1 %v71_v9  ;;  %v69_v17 = vld [vmem:[#allocation2 + $0xe0] sm:$0xff]  ;;  %v105_v19 = vld [vmem:[#allocation2 + $0x58] sm:$0xff]  ;;  %v186_v21 = vld [vmem:[#allocation2 + $0x148] sm:$0xff] }
  0x13   :  { %195 = vmatpush.msra.mxu2 %v190_v6  ;;  %112 = vmatpush.msra.mxu0 %v107_v10  ;;  %v68_v20 = vld [vmem:[#allocation2 + $0xd8] sm:$0xff]  ;;  %v104_v22 = vld [vmem:[#allocation2 + $0x50] sm:$0xff]  ;;  %v185_v23 = vld [vmem:[#allocation2 + $0x140] sm:$0xff] }
  0x14   :  { %135 = vmatpush.msra.mxu1 %v70_v12  ;;  %v67_v24 = vld [vmem:[#allocation2 + $0xd0] sm:$0xff]  ;;  %v103_v25 = vld [vmem:[#allocation2 + $0x48] sm:$0xff]  ;;  %v184_v27 = vld [vmem:[#allocation2 + $0x138] sm:$0xff] }
  0x15   :  { %196 = vmatpush.msra.mxu2 %v189_v11  ;;  %113 = vmatpush.msra.mxu0 %v106_v16  ;;  %v66_v26 = vld [vmem:[#allocation2 + $0xc8] sm:$0xff]  ;;  %v102_v28 = vld [vmem:[#allocation2 + $0x40] sm:$0xff]  ;;  %v183_v30 = vld [vmem:[#allocation2 + $0x130] sm:$0xff] }
  0x16   :  { %89 = vperm.xlu1 %429, %v81_v13   ;;  %84 = vperm.xlu0 %428, %v80_v14   ;;  %v65_v29 = vld [vmem:[#allocation2 + $0xc0] sm:$0xff]  ;;  %v101_v31 = vld [vmem:[#allocation2 + $0x38] sm:$0xff]  ;;  %v182_v33 = vld [vmem:[#allocation2 + $0x128] sm:$0xff] }
  0x17   :  { %197 = vmatpush.msra.mxu2 %v188_v15  ;;  %136 = vmatpush.msra.mxu1 %v69_v17  ;;  %v64_v32 = vld [vmem:[#allocation2 + $0xb8] sm:$0xff]  ;;  %v100_v34 = vld [vmem:[#allocation2 + $0x30] sm:$0xff]  ;;  %v181_v36 = vld [vmem:[#allocation2 + $0x120] sm:$0xff] }
  0x18   :  { %114 = vmatpush.msra.mxu0 %v105_v19  ;;  %v63_v35 = vld [vmem:[#allocation2 + $0xb0] sm:$0xff]  ;;  %v180_v37 = vld [vmem:[#allocation2 + $0x118] sm:$0xff]  ;;  %v178_v39 = vld [vmem:[#allocation2 + $0x108] sm:$0xff] }
  0x19   :  { %198 = vmatpush.msra.mxu2 %v187_v18  ;;  %137 = vmatpush.msra.mxu1 %v68_v20  ;;  %v179_v38 = vld [vmem:[#allocation2 + $0x110] sm:$0xff]  ;;  %v99_v40 = vld [vmem:[#allocation2 + $0x28] sm:$0xff]  ;;  %v98_v42 = vld [vmem:[#allocation2 + $0x20] sm:$0xff] }
  0x1a   :  { %115 = vmatpush.msra.mxu0 %v104_v22  ;;  %v62_v41 = vld [vmem:[#allocation2 + $0xa8] sm:$0xff]  ;;  %v61_v43 = vld [vmem:[#allocation2 + $0xa0] sm:$0xff]  ;;  %v97_v45 = vld [vmem:[#allocation2 + $0x18] sm:$0xff] }
  0x1b   :  { %199 = vmatpush.msra.mxu2 %v186_v21  ;;  %138 = vmatpush.msra.mxu1 %v67_v24  ;;  %v177_v44 = vld [vmem:[#allocation2 + $0x100] sm:$0xff]  ;;  %v60_v46 = vld [vmem:[#allocation2 + $0x98] sm:$0xff]  ;;  %v96_v47 = vld [vmem:[#allocation2 + $0x10] sm:$0xff] }
  0x1c   :  { %116 = vmatpush.msra.mxu0 %v103_v25  ;;  %v59_v48 = vld [vmem:[#allocation2 + $0x90] sm:$0xff]  ;;  %v95_v49 = vld [vmem:[#allocation2 + $0x8] sm:$0xff]  ;;  %v94_v51 = vld [vmem:[#allocation2] sm:$0xff] }
  0x1d   :  { %200 = vmatpush.msra.mxu2 %v185_v23  ;;  %139 = vmatpush.msra.mxu1 %v66_v26  ;;  %v58_v50 = vld [vmem:[#allocation2 + $0x88] sm:$0xff]  ;;  %v57_v52 = vld [vmem:[#allocation2 + $0x80] sm:$0xff]  ;;  %v266_v56 = vld [vmem:[#allocation5 + $0x78] sm:$0xff] }
  0x1e   :  { %117 = vmatpush.msra.mxu0 %v102_v28  ;;  %v573_v53 = vld [vmem:[%s648_s0] sm:$0xff]  ;;  %v579_v54 = vld [vmem:[%s648_s0 + $0x8] sm:$0xff]  ;;  %v265_v57 = vld [vmem:[#allocation5 + $0x70] sm:$0xff]  ;;  %267 = vmatpush.msra.mxu3 %v266_v56 }
  0x1f   :  { %201 = vmatpush.msra.mxu2 %v184_v27  ;;  %140 = vmatpush.msra.mxu1 %v65_v29  ;;  %v244_v58 = vld [vmem:[#allocation5 + $0xf8] sm:$0xff]  ;;  %v243_v59 = vld [vmem:[#allocation5 + $0xf0] sm:$0xff]  ;;  %v264_v60 = vld [vmem:[#allocation5 + $0x68] sm:$0xff]  ;;  %v156_v5 = vrot.slane %v573_v53, 1  ;;  %v157_v6 = vrot.slane %v579_v54, 1  ;;  %v73_v19 = vrot.slane %v573_v53, 7 }
  0x20   :  { %118 = vmatpush.msra.mxu0 %v101_v31  ;;  %v242_v61 = vld [vmem:[#allocation5 + $0xe8] sm:$0xff]  ;;  %268 = vmatpush.msra.mxu3 %v265_v57  ;;  %v263_v63 = vld [vmem:[#allocation5 + $0x60] sm:$0xff]  ;;  %v584_v1 = vld [vmem:[#allocation5 + $0x178] sm:$0xff]  ;;  %v74_v20 = vrot.slane %v579_v54, 7 }
  0x21   :  { %202 = vmatpush.msra.mxu2 %v183_v30  ;;  %141 = vmatpush.msra.mxu1 %v64_v32  ;;  %v241_v0 = vld [vmem:[#allocation5 + $0xe0] sm:$0xff]  ;;  %v262_v2 = vld [vmem:[#allocation5 + $0x58] sm:$0xff]  ;;  %v587_v4 = vld [vmem:[#allocation5 + $0x170] sm:$0xff]  ;;  %v159_v12 = vsel %vm158_vm0, %v156_v5, %v157_v6  ;;  %v160_v24 = vsel %vm158_vm0, %v157_v6, %v156_v5 }
  0x22   :  { %119 = vmatpush.msra.mxu0 %v100_v34  ;;  %269 = vmatpush.msra.mxu3 %v264_v60  ;;  %v240_v3 = vld [vmem:[#allocation5 + $0xd8] sm:$0xff]  ;;  %v591_v7 = vld [vmem:[#allocation5 + $0x168] sm:$0xff]  ;;  %v261_v8 = vld [vmem:[#allocation5 + $0x50] sm:$0xff]  ;;  %v79_v26 = vsel %vm77_vm1, %v74_v20, %v73_v19  ;;  %v78_v31 = vsel %vm77_vm1, %v73_v19, %v74_v20 }
  0x23   :  { %203 = vmatpush.msra.mxu2 %v182_v33  ;;  %142 = vmatpush.msra.mxu1 %v63_v35  ;;  %v239_v9 = vld [vmem:[#allocation5 + $0xd0] sm:$0xff]  ;;  %v260_v10 = vld [vmem:[#allocation5 + $0x48] sm:$0xff]  ;;  %v259_v13 = vld [vmem:[#allocation5 + $0x40] sm:$0xff] }
  0x24   :  { %120 = vmatpush.msra.mxu0 %v99_v40  ;;  %270 = vmatpush.msra.mxu3 %v263_v63  ;;  %v238_v11 = vld [vmem:[#allocation5 + $0xc8] sm:$0xff]  ;;  %v237_v14 = vld [vmem:[#allocation5 + $0xc0] sm:$0xff]  ;;  %v258_v17 = vld [vmem:[#allocation5 + $0x38] sm:$0xff] }
  0x25   :  { %204 = vmatpush.msra.mxu2 %v181_v36  ;;  %143 = vmatpush.msra.mxu1 %v62_v41  ;;  %v236_v18 = vld [vmem:[#allocation5 + $0xb8] sm:$0xff]  ;;  %v257_v21 = vld [vmem:[#allocation5 + $0x30] sm:$0xff]  ;;  %v256_v25 = vld [vmem:[#allocation5 + $0x28] sm:$0xff] }
  0x26   :  { %121 = vmatpush.msra.mxu0 %v98_v42  ;;  %271 = vmatpush.msra.mxu3 %v262_v2  ;;  %v235_v22 = vld [vmem:[#allocation5 + $0xb0] sm:$0xff]  ;;  %v332_v33 = vld [vmem:[#allocation5 + $0x160] sm:$0xff]  ;;  %v234_v35 = vld [vmem:[#allocation5 + $0xa8] sm:$0xff] }
  0x27   :  { %205 = vmatpush.msra.mxu2 %v180_v37  ;;  %144 = vmatpush.msra.mxu1 %v61_v43  ;;  %v255_v34 = vld [vmem:[#allocation5 + $0x20] sm:$0xff]  ;;  %v331_v36 = vld [vmem:[#allocation5 + $0x158] sm:$0xff]  ;;  %v253_v40 = vld [vmem:[#allocation5 + $0x10] sm:$0xff] }
  0x28   :  { %122 = vmatpush.msra.mxu0 %v97_v45  ;;  %272 = vmatpush.msra.mxu3 %v261_v8  ;;  %v254_v37 = vld [vmem:[#allocation5 + $0x18] sm:$0xff]  ;;  %v329_v42 = vld [vmem:[#allocation5 + $0x148] sm:$0xff]  ;;  %v328_v45 = vld [vmem:[#allocation5 + $0x140] sm:$0xff] }
  0x29   :  { %206 = vmatpush.msra.mxu2 %v179_v38  ;;  %145 = vmatpush.msra.mxu1 %v60_v46  ;;  %v233_v38 = vld [vmem:[#allocation5 + $0xa0] sm:$0xff]  ;;  %v232_v41 = vld [vmem:[#allocation5 + $0x98] sm:$0xff]  ;;  %v252_v43 = vld [vmem:[#allocation5 + $0x8] sm:$0xff] }
  0x2a   :  { %123 = vmatpush.msra.mxu0 %v96_v47  ;;  %273 = vmatpush.msra.mxu3 %v260_v10  ;;  %v251_v46 = vld [vmem:[#allocation5] sm:$0xff]  ;;  %v230_v47 = vld [vmem:[#allocation5 + $0x88] sm:$0xff]  ;;  %v323_v55 = vld [vmem:[#allocation5 + $0x118] sm:$0xff] }
  0x2b   :  { %207 = vmatpush.msra.mxu2 %v178_v39  ;;  %146 = vmatpush.msra.mxu1 %v59_v48  ;;  %v330_v39 = vld [vmem:[#allocation5 + $0x150] sm:$0xff]  ;;  %v327_v48 = vld [vmem:[#allocation5 + $0x138] sm:$0xff]  ;;  %v321_v57 = vld [vmem:[#allocation5 + $0x108] sm:$0xff] }
  0x2c   :  { %124 = vmatpush.msra.mxu0 %v95_v49  ;;  %274 = vmatpush.msra.mxu3 %v259_v13  ;;  %v229_v49 = vld [vmem:[#allocation5 + $0x80] sm:$0xff]  ;;  %v322_v56 = vld [vmem:[#allocation5 + $0x110] sm:$0xff] }
  0x2d   :  { %208 = vmatpush.msra.mxu2 %v177_v44  ;;  %147 = vmatpush.msra.mxu1 %v58_v50  ;;  %v231_v44 = vld [vmem:[#allocation5 + $0x90] sm:$0xff] }
  0x2e   :  { %125 = vmatpush.msra.mxu0 %v94_v51  ;;  %275 = vmatpush.msra.mxu3 %v258_v17  ;;  %v326_v50 = vld [vmem:[#allocation5 + $0x130] sm:$0xff]  ;;  %v325_v51 = vld [vmem:[#allocation5 + $0x128] sm:$0xff] }
  0x2f   :  { %148 = vmatpush.msra.mxu1 %v57_v52  ;;  %390 = vmatpush.msrb.mxu2 %v244_v58  ;;  %v324_v52 = vld [vmem:[#allocation5 + $0x120] sm:$0xff] }
  0x30   :  { %149 = vmatmul.f32.vlgmr.msra.gmra.mxu1 %v573_v53  ;;  %290 = vmatpush.msrb.mxu0 %v244_v58  ;;  %v320_v58 = vld [vmem:[#allocation5 + $0x100] sm:$0xff] }
  0x31   :  { %391 = vmatpush.msrb.mxu2 %v243_v59  ;;  %336 = vmatpush.msrb.mxu1 %v584_v1 }
  0x32   :  { %291 = vmatpush.msrb.mxu0 %v243_v59  ;;  %276 = vmatpush.msra.mxu3 %v257_v21 }
  0x33   :  { %392 = vmatpush.msrb.mxu2 %v242_v61  ;;  %337 = vmatpush.msrb.mxu1 %v587_v4 }
  0x34   :  { %292 = vmatpush.msrb.mxu0 %v242_v61  ;;  %277 = vmatpush.msra.mxu3 %v256_v25 }
  0x35   :  { %393 = vmatpush.msrb.mxu2 %v241_v0  ;;  %338 = vmatpush.msrb.mxu1 %v591_v7 }
  0x36   :  { %293 = vmatpush.msrb.mxu0 %v241_v0  ;;  %278 = vmatpush.msra.mxu3 %v255_v34  ;;  %v430_v0 = vld [vmem:[%s652_s4] ss:$0 sm:$0xff] }
  0x37   :  { %394 = vmatpush.msrb.mxu2 %v240_v3  ;;  %339 = vmatpush.msrb.mxu1 %v332_v33 }
  0x38   :  { %152 = vmatmul.f32.gmra.mxu1 %v579_v54  ;;  %294 = vmatpush.msrb.mxu0 %v240_v3 }
  0x39   :  { %395 = vmatpush.msrb.mxu2 %v239_v9  ;;  %340 = vmatpush.msrb.mxu1 %v331_v36 }
  0x3a   :  { %295 = vmatpush.msrb.mxu0 %v239_v9  ;;  %279 = vmatpush.msra.mxu3 %v254_v37 }
  0x3b   :  { %396 = vmatpush.msrb.mxu2 %v238_v11  ;;  %341 = vmatpush.msrb.mxu1 %v330_v39 }
  0x3c   :  { %296 = vmatpush.msrb.mxu0 %v238_v11  ;;  %280 = vmatpush.msra.mxu3 %v253_v40 }
  0x3d   :  { %397 = vmatpush.msrb.mxu2 %v237_v14  ;;  %342 = vmatpush.msrb.mxu1 %v329_v42 }
  0x3e   :  { %297 = vmatpush.msrb.mxu0 %v237_v14  ;;  %281 = vmatpush.msra.mxu3 %v252_v43 }
  0x3f   :  { %398 = vmatpush.msrb.mxu2 %v236_v18  ;;  %343 = vmatpush.msrb.mxu1 %v328_v45 }
  0x40   :  { %298 = vmatpush.msrb.mxu0 %v236_v18  ;;  %282 = vmatpush.msra.mxu3 %v251_v46 }
  0x41   :  { %399 = vmatpush.msrb.mxu2 %v235_v22  ;;  %344 = vmatpush.msrb.mxu1 %v327_v48 }
  0x42   :  { %299 = vmatpush.msrb.mxu0 %v235_v22  ;;  %406 = vmatpush.msrb.mxu3 %v584_v1 }
  0x43   :  { %400 = vmatpush.msrb.mxu2 %v234_v35  ;;  %345 = vmatpush.msrb.mxu1 %v326_v50 }
  0x44   :  { %300 = vmatpush.msrb.mxu0 %v234_v35  ;;  %407 = vmatpush.msrb.mxu3 %v587_v4 }
  0x45   :  { %401 = vmatpush.msrb.mxu2 %v233_v38  ;;  %346 = vmatpush.msrb.mxu1 %v325_v51 }
  0x46   :  { %301 = vmatpush.msrb.mxu0 %v233_v38  ;;  %408 = vmatpush.msrb.mxu3 %v591_v7 }
  0x47   :  { %402 = vmatpush.msrb.mxu2 %v232_v41  ;;  %347 = vmatpush.msrb.mxu1 %v324_v52 }
  0x48   :  { %302 = vmatpush.msrb.mxu0 %v232_v41  ;;  %409 = vmatpush.msrb.mxu3 %v332_v33 }
  0x49   :  { %403 = vmatpush.msrb.mxu2 %v231_v44  ;;  %348 = vmatpush.msrb.mxu1 %v323_v55 }
  0x4a   :  { %303 = vmatpush.msrb.mxu0 %v231_v44  ;;  %410 = vmatpush.msrb.mxu3 %v331_v36 }
  0x4b   :  { %404 = vmatpush.msrb.mxu2 %v230_v47  ;;  %349 = vmatpush.msrb.mxu1 %v322_v56 }
  0x4c   :  { %304 = vmatpush.msrb.mxu0 %v230_v47  ;;  %411 = vmatpush.msrb.mxu3 %v330_v39 }
  0x4d   :  { %405 = vmatpush.msrb.mxu2 %v229_v49  ;;  %350 = vmatpush.msrb.mxu1 %v321_v57 }
  0x4e   :  { %305 = vmatpush.msrb.mxu0 %v229_v49  ;;  %412 = vmatpush.msrb.mxu3 %v329_v42 }
  0x4f   :  { %351 = vmatpush.msrb.mxu1 %v320_v58 }
  0x50   :  { %413 = vmatpush.msrb.mxu3 %v328_v45 }
  0x52   :  { %414 = vmatpush.msrb.mxu3 %v327_v48 }
  0x54   :  { %415 = vmatpush.msrb.mxu3 %v326_v50 }
  0x56   :  { %416 = vmatpush.msrb.mxu3 %v325_v51 }
  0x58   :  { %417 = vmatpush.msrb.mxu3 %v324_v52 }
  0x5a   :  { %418 = vmatpush.msrb.mxu3 %v323_v55 }
  0x5c   :  { %419 = vmatpush.msrb.mxu3 %v322_v56 }
  0x5e   :  { %420 = vmatpush.msrb.mxu3 %v321_v57 }
  0x60   :  { %421 = vmatpush.msrb.mxu3 %v320_v58 }
  0x80   :  { %v598_v15 = vpop.permute.xlu0 %166  ;;  %v604_v23 = vpop.permute.xlu1 %171 }
  0x81   :  { %v174_v16 = vmul.f32 %v598_v15, %v159_v12  ;;  %v175_v27 = vmul.f32 %v604_v23, %v160_v24 }
  0x83   :  { %209 = vmatmul.f32.vlgmr.msra.gmra.mxu2 %v174_v16 }
  0x88   :  { %v611_v28 = vpop.permute.xlu0 %84  ;;  %v614_v30 = vpop.permute.xlu1 %89 }
  0x89   :  { %v92_v29 = vmul.f32 %v611_v28, %v79_v26  ;;  %v93_v32 = vmul.f32 %v614_v30, %v78_v31 }
  0x8b   :  { %126 = vmatmul.f32.vlgmr.msra.gmra.mxu0 %v92_v29  ;;  %212 = vmatmul.f32.gmra.mxu2 %v175_v27 }
  0x93   :  { %129 = vmatmul.f32.gmra.mxu0 %v93_v32 }
  0xad   :  { %v150_v59 = vpop.f32.mrf.mxu1 }
  0xb5   :  { %v153_v3 = vpop.f32.mrf.mxu1 }
 0x106   :  { %v210_v60 = vpop.f32.mrf.mxu2 }
 0x108   :  { %v127_v61 = vpop.f32.mrf.mxu0 }
 0x109   :  { %v151_v63 = vadd.f32 %v150_v59, %v127_v61 }
 0x10b   :  { %v216_v1 = vadd.f32 %v210_v60, %v151_v63 }
 0x10d   :  { %v219_v2 = vadd.f32 %v430_v0, %v216_v1 }
 0x10e   :  { %v213_v8 = vpop.f32.mrf.mxu2 }
 0x10f   :  { %vm221_vm2 = vcmp.gt.f32.partialorder %v219_v2, 0.0  ;;  %v223_v4 = vmul.f32 0.2, %v219_v2 }
 0x110   :  { %v130_v5 = vpop.f32.mrf.mxu0 }
 0x111   :  { %v154_v6 = vadd.f32 %v153_v3, %v130_v5  ;;  %v225_v7 = vsel %vm221_vm2, %v219_v2, %v223_v4 }
 0x112   :  { %306 = vmatmul.f32.vlgmr.msrb.gmra.mxu0 %v225_v7  ;;  %v245_v13 = vrot.slane %v225_v7, 7  ;;  %v313_v14 = vrot.slane %v225_v7, 1 }
 0x113   :  { %v217_v9 = vadd.f32 %v213_v8, %v154_v6 }
 0x115   :  { %v220_v10 = vadd.f32 %v430_v0, %v217_v9 }
 0x117   :  { %vm222_vm3 = vcmp.gt.f32.partialorder %v220_v10, 0.0  ;;  %v224_v11 = vmul.f32 0.2, %v220_v10 }
 0x119   :  { %v226_v12 = vsel %vm222_vm3, %v220_v10, %v224_v11 }
 0x11a   :  { %v246_v16 = vrot.slane %v226_v12, 7  ;;  %309 = vmatmul.f32.vlgmr.msrb.gmra.mxu2 %v226_v12  ;;  %v314_v17 = vrot.slane %v226_v12, 1 }
 0x11c   :  { %v248_v18 = vsel %vm77_vm1, %v246_v16, %v245_v13  ;;  %v315_v19 = vsel %vm158_vm0, %v313_v14, %v314_v17  ;;  %v247_v22 = vsel %vm77_vm1, %v245_v13, %v246_v16  ;;  %v316_v25 = vsel %vm158_vm0, %v314_v17, %v313_v14 }
 0x11d   :  { %v249_v20 = vmul.f32 %v248_v18, %v611_v28  ;;  %v317_v21 = vmul.f32 %v315_v19, %v598_v15  ;;  %v250_v24 = vmul.f32 %v247_v22, %v614_v30  ;;  %v318_v26 = vmul.f32 %v316_v25, %v604_v23  ;;  %v431_v15 = vld [vmem:[%s652_s4 + $0x1] ss:$0 sm:$0xff] }
 0x11f   :  { %283 = vmatmul.f32.vlgmr.msra.gmra.mxu3 %v249_v20  ;;  %352 = vmatmul.f32.vlgmr.msrb.gmra.mxu1 %v317_v21 }
 0x127   :  { %286 = vmatmul.f32.gmra.mxu3 %v250_v24 }
 0x12f   :  { %355 = vmatmul.f32.vlgmr.msrb.gmra.mxu3 %v318_v26 }
 0x18f   :  { %v307_v27 = vpop.f32.mrf.mxu0 }
 0x19c   :  { %v353_v28 = vpop.f32.mrf.mxu1 }
 0x19d   :  { %v310_v35 = vpop.f32.mrf.mxu2 }
 0x1a2   :  { %v284_v29 = vpop.f32.mrf.mxu3 }
 0x1a3   :  { %v308_v31 = vadd.f32 %v307_v27, %v284_v29 }
 0x1a5   :  { %v359_v32 = vadd.f32 %v353_v28, %v308_v31 }
 0x1a7   :  { %v362_v33 = vadd.f32 %v431_v15, %v359_v32 }
 0x1a9   :  { %v364_v34 = vadd.f32 %v362_v33, %v573_v53 }
 0x1aa   :  { %v287_v30 = vpop.f32.mrf.mxu3 }
 0x1ab   :  { %366 = vst [vmem:[#allocation7] sm:$0xff] %v364_v34  ;;  %v311_v62 = vadd.f32 %v310_v35, %v287_v30 }
 0x1b2   :  { %v356_v36 = vpop.f32.mrf.mxu3 }
 0x1b3   :  { %v360_v37 = vadd.f32 %v356_v36, %v311_v62 }
 0x1b5   :  { %v363_v23 = vadd.f32 %v431_v15, %v360_v37 }
 0x1b7   :  { %v365_v38 = vadd.f32 %v363_v23, %v579_v54 }
 0x1b9   :  { %367 = vst [vmem:[#allocation7 + $0x8] sm:$0xff] %v365_v38 }
 0x1ba   :  { %380 = dma.vmem_to_hbm [thread:$0]  %s373_s18, 256, %s375_s21, [#allocation4], %s511_s26, %s511_s26, %s512_s27  }
 0x1bb   :  { %508 = dma.done.wait [#allocation4], 256  }
 0x1bc   :  { %509 = vsyncadd [#allocation4], 4294967040 }
 0x1bd   :  { %385 = vsyncpa [#allocation3], 1 }
 0x1be   :  { %386 = vsyncpa [#allocation6], 1 }
 0x1bf   :  { %387 = vsyncpa [#allocation4], 1 }

</bundles_post_ra>
